<compile_context>
chip_gen: v7x
topology: tpu7x:2x2x1
jax: 0.10.0
libtpu: 0.0.40
codegen_flags: <defaults>
</compile_context>

<pallas_src>
import jax
import jax.numpy as jnp
from jax.experimental import pallas as pl
from jax.experimental.pallas import tpu as pltpu


def _round_up(x, m):
    return ((x + m - 1) // m) * m


def _nconv_kernel(at_ref, x_ref, o_ref):
    # at_ref: (W, V)   A^T, resident in VMEM across all grid steps
    # x_ref:  (V, TN)  one lane-dense column tile of x2d
    # o_ref:  (W, TN)  matching output tile
    o_ref[...] = jnp.dot(
        at_ref[...], x_ref[...], preferred_element_type=jnp.float32
    ).astype(o_ref.dtype)


def _pick_col_tile(bl_padded, V, W, itemsize, *,
                   max_tile=2048, vmem_budget=16 * 1024 * 1024):
    """Largest power-of-two lane tile (>= 128) whose double-buffered VMEM
    footprint (x tile + out tile, x2 buffers, + resident A^T) fits the budget
    and does not exceed the padded problem width."""
    tile = 128
    cap = min(max_tile, bl_padded)
    while tile * 2 <= cap:
        nxt = tile * 2
        need = 2 * (V + W) * nxt * itemsize + 2 * W * V * itemsize
        if need > vmem_budget:
            break
        tile = nxt
    return tile


def nconv(x, A, *, col_tile=None):
    """x: (N, C, V, L), A: (V, W) -> (N, C, W, L). Matches torch.einsum('ncvl,vw->ncwl')."""
    N, C, V, L = x.shape
    V2, W = A.shape
    assert V == V2, "A first dim must match x node dim"

    dtype = jnp.result_type(x.dtype, A.dtype)
    itemsize = jnp.dtype(dtype).itemsize

    B = N * C
    BL = B * L

    # Lay x out lane-dense: (N,C,V,L) -> (V,N,C,L) -> (V, B*L).
    x2d = jnp.transpose(x, (2, 0, 1, 3)).reshape(V, BL).astype(dtype)
    # Pre-transpose A so the kernel contracts over the LHS last dim.
    a_t = jnp.transpose(A).astype(dtype)  # (W, V)

    bl_min = _round_up(BL, 128)
    if col_tile is None:
        tile = _pick_col_tile(bl_min, V, W, itemsize)
    else:
        tile = min(_round_up(col_tile, 128), bl_min)

    blp = _round_up(BL, tile)
    if blp != BL:
        x2d = jnp.pad(x2d, ((0, 0), (0, blp - BL)))

    grid = (blp // tile,)

    out2d = pl.pallas_call(
        _nconv_kernel,
        out_shape=jax.ShapeDtypeStruct((W, blp), dtype),
        grid_spec=pltpu.PrefetchScalarGridSpec(
            num_scalar_prefetch=0,
            grid=grid,
            in_specs=[
                pl.BlockSpec((W, V), lambda j: (0, 0)),      # A^T fully resident
                pl.BlockSpec((V, tile), lambda j: (0, j)),   # column tile of x2d
            ],
            out_specs=pl.BlockSpec((W, tile), lambda j: (0, j)),
        ),
        compiler_params=pltpu.CompilerParams(
            dimension_semantics=("parallel",),
        ),
        cost_estimate=pl.CostEstimate(
            flops=2 * BL * V * W,
            transcendentals=0,
            bytes_accessed=(V * BL + W * BL + V * W) * itemsize,
        ),
    )(a_t, x2d)

    # Drop padding, restore layout: (W, B*L) -> (W,N,C,L) -> (N,C,W,L).
    out2d = out2d[:, :BL]
    out = out2d.reshape(W, N, C, L).transpose(1, 2, 0, 3)
    return out


_nconv_jit = jax.jit(nconv)


def _check(N, C, V, W, L, key):
    kx, ka = jax.random.split(key)
    x = jax.random.normal(kx, (N, C, V, L), dtype=jnp.float32)
    A = jax.random.normal(ka, (V, W), dtype=jnp.float32)

    out = jax.block_until_ready(_nconv_jit(x, A))
    ref = jnp.einsum("ncvl,vw->ncwl", x, A)

    assert out.shape == (N, C, W, L), (out.shape, (N, C, W, L))
    assert jnp.allclose(out, ref, atol=1e-4, rtol=1e-4), "mismatch vs reference"


if __name__ == "__main__":
    key = jax.random.PRNGKey(0)
    k1, k2, k3 = jax.random.split(key, 3)

    # Small deterministic example consistent with GraphWaveNet usage:
    # batch N=2, channels C=4, nodes V=16, sequence length L=8  (B*L = 64).
    _check(N=2, C=4, V=16, W=16, L=8, key=k1)

    # Exercises the multi-step grid + padding path
    # (B*L = 640 -> tile 512, padded to 1024, grid of 2 parallel steps).
    _check(N=2, C=8, V=16, W=16, L=40, key=k2)

    # Rectangular A (v != w) to cover the general einsum contract.
    _check(N=2, C=4, V=16, W=24, L=8, key=k3)

    print("KERNEL_OK")
</pallas_src>

<mosaic_0001>
module attributes {stable_mosaic.version = 11 : i64} {
  func.func @_nconv_kernel(%arg0: i32, %arg1: memref<16x16xf32, #tpu.memory_space<vmem>>, %arg2: memref<16x128xf32, #tpu.memory_space<vmem>>, %arg3: memref<16x128xf32, #tpu.memory_space<vmem>>) attributes {dimension_semantics = [#tpu.dimension_semantics<parallel>], iteration_bounds = array<i64: 1>, scalar_prefetch = 0 : i64, scratch_operands = 0 : i64, tpu.core_type = #tpu.core_type<tc>, window_params = [{pipeline_mode = #tpu.pipeline_mode<synchronous>, transform_indices = @transform_0, window_bounds = array<i64: 16, 16>}, {transform_indices = @transform_1, window_bounds = array<i64: 16, 128>}, {transform_indices = @transform_2, window_bounds = array<i64: 16, 128>}]} {
    %c0 = arith.constant 0 : index
    %c0_0 = arith.constant 0 : index
    %0 = vector.load %arg1[%c0, %c0_0] : memref<16x16xf32, #tpu.memory_space<vmem>>, vector<16x16xf32>
    %c0_1 = arith.constant 0 : index
    %c0_2 = arith.constant 0 : index
    %1 = vector.load %arg2[%c0_1, %c0_2] : memref<16x128xf32, #tpu.memory_space<vmem>>, vector<16x128xf32>
    %cst = arith.constant dense<0.000000e+00> : vector<16x128xf32>
    %2 = tpu.matmul %0, %1, %cst {dimension_numbers = #tpu.dot_dimension_numbers<[1], [0], [0], [1], [0, 0, 1, 1], [], []>} : vector<16x16xf32>, vector<16x128xf32>, vector<16x128xf32> -> vector<16x128xf32>
    %c0_3 = arith.constant 0 : index
    %c0_4 = arith.constant 0 : index
    %3 = vector.load %arg3[%c0_3, %c0_4] : memref<16x128xf32, #tpu.memory_space<vmem>>, vector<16x128xf32>
    tpu.vector_store %arg3[%c0_3, %c0_4], %2 {strides = array<i32>} : memref<16x128xf32, #tpu.memory_space<vmem>>, vector<16x128xf32>,
    return
  }
  func.func @transform_0(%arg0: i32) -> (i32, i32) {
    %c0_i32 = arith.constant 0 : i32
    %c0_i32_0 = arith.constant 0 : i32
    %c0_i32_1 = arith.constant 0 : i32
    return %c0_i32, %c0_i32_0 : i32, i32
  }
  func.func @transform_1(%arg0: i32) -> (i32, i32) {
    %c0_i32 = arith.constant 0 : i32
    %c0_i32_0 = arith.constant 0 : i32
    return %c0_i32, %arg0 : i32, i32
  }
  func.func @transform_2(%arg0: i32) -> (i32, i32) {
    %c0_i32 = arith.constant 0 : i32
    %c0_i32_0 = arith.constant 0 : i32
    return %c0_i32, %arg0 : i32, i32
  }
}

</mosaic_0001>

<bundles_post_ra>
// kernel: nconv.1
= control target key start
LH: loop header
LB: loop body
LE: loop exit
PB: predicated region body
PF: predicated region fallthrough
CT: control target
= control target key end

     0   :  { %vm15_vm0 = vcmask 130048   ;;  %s153_s1 = inlined_call_operand.vmem [shape: f32[16,128], index: 1, kind: input, shape index: {}]   ;;  %s154_s0 = inlined_call_operand.vmem [shape: f32[16,16], index: 0, kind: input, shape index: {}]   ;;  %s155_s2 = inlined_call_operand.vmem [shape: f32[16,128], index: 2, kind: output, shape index: {}]  }
   0x1   :  { %v13_v0 = vld [vmem:[%s153_s1] sm:$0xff]  ;;  %v14_v1 = vld [vmem:[%s153_s1 + $0x8] sm:$0xff] }
   0x2   :  { %v11_v2 = vld [vmem:[%s154_s0] sm:$0xff]  ;;  %v116_v3 = vpack.c.bf16 %v14_v1, %v13_v0  ;;  %v12_v4 = vld [vmem:[%s154_s0 + $0x8] sm:$0xff] }
   0x3   :  { %113 = vmatprep.mubr.msk.f32.mxu0 %vm15_vm0, %v11_v2 }
   0x4   :  { %117 = vmatprep.subr.bf16.mxu0 %v116_v3 }
   0x5   :  { %119 = vmatpush3.bf16.msra.mxu0 %v116_v3 }
   0x8   :  { %114 = vmatmul.mubr.msk.f32.vlgmr.msra.gmra.mrb[0].mxu0 %vm15_vm0, %v12_v4 }
  0xdb   :  { %v115_v5 = vpop.f32.mrb[0].mxu0 }
  0xdc   :  { %98 = vst [vmem:[%s155_s2 + $0x8] sm:$0xff] %v115_v5  ;;  %v88_v6 = vpop.f32.mrb[1].mxu0 }
  0xdd   :  { %97 = vst [vmem:[%s155_s2] sm:$0xff] %v88_v6 }

</bundles_post_ra>
